<compile_context>
chip_gen: v7x
topology: tpu7x:2x2x1
jax: 0.10.0
libtpu: 0.0.40
codegen_flags: <defaults>
</compile_context>

<pallas_src>
import functools

import jax
import jax.numpy as jnp
from jax import lax
from jax.experimental import pallas as pl
from jax.experimental.pallas import tpu as pltpu


def _attn_score_kernel(x_ref, w_ref, b_ref, o_ref, q_scr, k_scr,
                       *, tq, heads, d, f):
    # x_ref:   (N, F)        current batch's tokens (storage dtype)
    # w_ref:   (F, 2F)       fused [Wq*scale | Wk] projection for all heads
    # b_ref:   (1, 2F)       fused [bq*scale | bk] bias (f32)
    # o_ref:   (H, TQ, N)    softmaxed attention weights for this query tile
    # q_scr:   (H, N, D)     scaled queries for all heads (storage dtype)
    # k_scr:   (H, N, D)     keys for all heads (storage dtype)
    qi = pl.program_id(1)

    @pl.when(qi == 0)
    def _():
        # One wide, lane-dense projection per batch; f32 accumulate on the MXU,
        # then cast down once to the storage dtype and split per head with
        # static slices (heads is a compile-time constant).
        qk = jnp.dot(x_ref[...], w_ref[...],
                     preferred_element_type=jnp.float32) + b_ref[...]
        qk = qk.astype(q_scr.dtype)
        for hh in range(heads):
            q_scr[hh] = qk[:, hh * d:(hh + 1) * d]
            k_scr[hh] = qk[:, f + hh * d:f + (hh + 1) * d]

    row0 = pl.multiple_of(qi * tq, tq)
    for hh in range(heads):
        q = q_scr.at[hh][pl.ds(row0, tq), :]   # (TQ, D), already scaled
        k = k_scr.at[hh][...]                  # (N, D)

        # Scores: contract the D axes directly (q @ k^T) — no explicit
        # transpose of K, f32 accumulation on the MXU.
        s = lax.dot_general(q, k, (((1,), (1,)), ((), ())),
                            preferred_element_type=jnp.float32)  # (TQ, N)

        # Numerically-stable softmax over the key axis.
        s = s - jnp.max(s, axis=-1, keepdims=True)
        e = jnp.exp(s)
        denom = jnp.sum(e, axis=-1, keepdims=True)
        inv = pl.reciprocal(denom, approx=True)   # EUP vrcp: effectively free
        o_ref[hh] = (e * inv).astype(o_ref.dtype)


def _pick_tq_and_vmem(N, F, H, D, in_itemsize, out_itemsize):
    """Largest query-row tile (multiple-of-8 divisor of N, <=512) fitting VMEM."""
    budget = 40 * 1024 * 1024          # working-set target (headroom under 48 MiB)
    fixed = (2 * N * F * in_itemsize           # x block (double-buffered)
             + 2 * F * (2 * F) * in_itemsize   # W_all (double-buffered)
             + 2 * (2 * F) * 4                 # bias
             + 2 * H * N * D * in_itemsize)    # Q/K scratch

    start = 8 * (min(N, 512) // 8)
    cands = [c for c in range(start, 0, -8) if N % c == 0]
    if not cands:
        # TODO(synk): for large N with no multiple-of-8 divisor, a pl.cdiv grid
        # with a masked ragged last tile would be needed; fall back to tq = N.
        cands = [N]

    tq = cands[-1]
    for c in cands:
        if fixed + 2 * H * c * N * out_itemsize <= budget:
            tq = c
            break

    total = fixed + 2 * H * tq * N * out_itemsize
    vmem_limit = int(min(48 * 1024 * 1024,
                         max(32 * 1024 * 1024, total + 4 * 1024 * 1024)))
    return tq, vmem_limit


def attention_score(x, qkv_weight, qkv_bias, num_heads, out_dtype=jnp.float32):
    """x: (B, N, F); qkv_weight: (3F, F) torch-Linear layout; qkv_bias: (3F,)."""
    B, N, F = x.shape
    H = num_heads
    D = F // H
    scale = float(D) ** -0.5

    # torch Linear: y = x @ W.T + b.  Take the Q and K thirds, fold the softmax
    # scale into the Q projection, and fuse them into a single (F, 2F) weight
    # so the whole-batch projection is one wide MXU matmul.
    w_q = qkv_weight[0:F].T * scale            # (F, F)
    w_k = qkv_weight[F:2 * F].T                # (F, F)
    b_q = qkv_bias[0:F] * scale
    b_k = qkv_bias[F:2 * F]
    w_all = jnp.concatenate([w_q, w_k], axis=1).astype(x.dtype)       # (F, 2F)
    b_all = jnp.concatenate([b_q, b_k])[None, :].astype(jnp.float32)  # (1, 2F)

    tq, vmem_limit = _pick_tq_and_vmem(
        N, F, H, D,
        jnp.dtype(x.dtype).itemsize, jnp.dtype(out_dtype).itemsize)
    n_q = N // tq

    kernel = functools.partial(_attn_score_kernel, tq=tq, heads=H, d=D, f=F)

    return pl.pallas_call(
        kernel,
        out_shape=jax.ShapeDtypeStruct((B, H, N, N), out_dtype),
        grid_spec=pltpu.PrefetchScalarGridSpec(
            num_scalar_prefetch=0,
            grid=(B, n_q),
            in_specs=[
                pl.BlockSpec((None, N, F), lambda b, q: (b, 0, 0)),     # x
                pl.BlockSpec((F, 2 * F), lambda b, q: (0, 0)),          # W_all
                pl.BlockSpec((1, 2 * F), lambda b, q: (0, 0)),          # b_all
            ],
            out_specs=pl.BlockSpec((None, H, tq, N),
                                   lambda b, q: (b, 0, q, 0)),
            scratch_shapes=[
                pltpu.VMEM((H, N, D), x.dtype),   # scaled Q, all heads
                pltpu.VMEM((H, N, D), x.dtype),   # K, all heads
            ],
        ),
        compiler_params=pltpu.CompilerParams(
            # qi axis must stay "arbitrary": Q/K scratch is reused across it.
            dimension_semantics=("parallel", "arbitrary"),
            vmem_limit_bytes=vmem_limit,
        ),
    )(x, w_all, b_all)


def attention_score_ref(x, qkv_weight, qkv_bias, num_heads):
    """Plain-JAX reference mirroring the PyTorch forward."""
    B, N, F = x.shape
    H = num_heads
    D = F // H
    qkv = x @ qkv_weight.T + qkv_bias                       # (B, N, 3F)
    q, k, _ = jnp.split(qkv, 3, axis=-1)
    q = q.reshape(B, N, H, D).transpose(0, 2, 1, 3)         # (B, H, N, D)
    k = k.reshape(B, N, H, D).transpose(0, 2, 1, 3)
    s = jnp.einsum("bhnd,bhmd->bhnm", q, k) * (D ** -0.5)
    return jax.nn.softmax(s, axis=-1)


if __name__ == "__main__":
    B, N, F, H = 2, 8, 32, 4

    key = jax.random.PRNGKey(0)
    kx, kw, kb = jax.random.split(key, 3)

    x = jax.random.normal(kx, (B, N, F), dtype=jnp.float32)

    # Deterministic torch-Linear-style init: U(-1/sqrt(F), 1/sqrt(F)).
    bound = 1.0 / (F ** 0.5)
    qkv_weight = jax.random.uniform(kw, (3 * F, F), jnp.float32, -bound, bound)
    qkv_bias = jax.random.uniform(kb, (3 * F,), jnp.float32, -bound, bound)

    out = attention_score(x, qkv_weight, qkv_bias, H)
    out = jax.block_until_ready(out)

    ref = attention_score_ref(x, qkv_weight, qkv_bias, H)
    assert out.shape == (B, H, N, N)
    # approx=True reciprocal (EUP vrcp) introduces ~1e-4 relative error.
    assert jnp.allclose(out, ref, atol=2e-3, rtol=2e-3)

    # NOTE: attn_weight_dropout with rate 0.0 is defined in __init__ but never
    # applied in the reference forward, so no dropout is implemented here.
    print("KERNEL_OK")
</pallas_src>

<mosaic_0001>
module attributes {stable_mosaic.version = 11 : i64} {
  func.func @_attn_score_kernel(%arg0: i32, %arg1: i32, %arg2: memref<1x8x32xf32, #tpu.memory_space<vmem>>, %arg3: memref<32x64xf32, #tpu.memory_space<vmem>>, %arg4: memref<1x64xf32, #tpu.memory_space<vmem>>, %arg5: memref<1x4x8x8xf32, #tpu.memory_space<vmem>>, %arg6: memref<4x8x8xf32, #tpu.memory_space<vmem>>, %arg7: memref<4x8x8xf32, #tpu.memory_space<vmem>>) attributes {dimension_semantics = [#tpu.dimension_semantics<parallel>, #tpu.dimension_semantics<arbitrary>], iteration_bounds = array<i64: 2, 1>, scalar_prefetch = 0 : i64, scratch_operands = 2 : i64, tpu.core_type = #tpu.core_type<tc>, window_params = [{transform_indices = @transform_0, window_bounds = array<i64: 1, 8, 32>}, {pipeline_mode = #tpu.pipeline_mode<synchronous>, transform_indices = @transform_1, window_bounds = array<i64: 32, 64>}, {pipeline_mode = #tpu.pipeline_mode<synchronous>, transform_indices = @transform_2, window_bounds = array<i64: 1, 64>}, {transform_indices = @transform_3, window_bounds = array<i64: 1, 4, 8, 8>}]} {
    %c0_i32 = arith.constant 0 : i32
    %0 = arith.cmpi eq, %arg1, %c0_i32 : i32
    %1 = arith.extui %0 : i1 to i32
    %c0_i32_0 = arith.constant 0 : i32
    %2 = arith.cmpi ne, %1, %c0_i32_0 : i32
    scf.if %2 {
      %c0_49 = arith.constant 0 : index
      %c0_50 = arith.constant 0 : index
      %c0_51 = arith.constant 0 : index
      %85 = vector.load %arg2[%c0_49, %c0_50, %c0_51] : memref<1x8x32xf32, #tpu.memory_space<vmem>>, vector<1x8x32xf32>
      %86 = vector.shape_cast %85 : vector<1x8x32xf32> to vector<8x32xf32>
      %c0_52 = arith.constant 0 : index
      %c0_53 = arith.constant 0 : index
      %87 = vector.load %arg3[%c0_52, %c0_53] : memref<32x64xf32, #tpu.memory_space<vmem>>, vector<32x64xf32>
      %cst_54 = arith.constant dense<0.000000e+00> : vector<8x64xf32>
      %88 = tpu.matmul %86, %87, %cst_54 {dimension_numbers = #tpu.dot_dimension_numbers<[1], [0], [0], [1], [0, 0, 1, 1], [], []>} : vector<8x32xf32>, vector<32x64xf32>, vector<8x64xf32> -> vector<8x64xf32>
      %c0_55 = arith.constant 0 : index
      %c0_56 = arith.constant 0 : index
      %89 = vector.load %arg4[%c0_55, %c0_56] : memref<1x64xf32, #tpu.memory_space<vmem>>, vector<1x64xf32>
      %90 = vector.broadcast %89 : vector<1x64xf32> to vector<8x64xf32>
      %91 = arith.addf %88, %90 : vector<8x64xf32>
      %92 = vector.extract_strided_slice %91 {offsets = [0, 0], sizes = [8, 8], strides = [1, 1]} : vector<8x64xf32> to vector<8x8xf32>
      %c0_57 = arith.constant 0 : index
      %c0_58 = arith.constant 0 : index
      %c0_59 = arith.constant 0 : index
      %93 = vector.load %arg6[%c0_57, %c0_58, %c0_59] : memref<4x8x8xf32, #tpu.memory_space<vmem>>, vector<1x8x8xf32>
      %94 = vector.shape_cast %93 : vector<1x8x8xf32> to vector<8x8xf32>
      %95 = vector.shape_cast %92 : vector<8x8xf32> to vector<1x8x8xf32>
      tpu.vector_store %arg6[%c0_57, %c0_58, %c0_59], %95 {strides = array<i32>} : memref<4x8x8xf32, #tpu.memory_space<vmem>>, vector<1x8x8xf32>,
      %96 = vector.extract_strided_slice %91 {offsets = [0, 32], sizes = [8, 8], strides = [1, 1]} : vector<8x64xf32> to vector<8x8xf32>
      %c0_60 = arith.constant 0 : index
      %c0_61 = arith.constant 0 : index
      %c0_62 = arith.constant 0 : index
      %97 = vector.load %arg7[%c0_60, %c0_61, %c0_62] : memref<4x8x8xf32, #tpu.memory_space<vmem>>, vector<1x8x8xf32>
      %98 = vector.shape_cast %97 : vector<1x8x8xf32> to vector<8x8xf32>
      %99 = vector.shape_cast %96 : vector<8x8xf32> to vector<1x8x8xf32>
      tpu.vector_store %arg7[%c0_60, %c0_61, %c0_62], %99 {strides = array<i32>} : memref<4x8x8xf32, #tpu.memory_space<vmem>>, vector<1x8x8xf32>,
      %100 = vector.extract_strided_slice %91 {offsets = [0, 8], sizes = [8, 8], strides = [1, 1]} : vector<8x64xf32> to vector<8x8xf32>
      %c1_63 = arith.constant 1 : index
      %c0_64 = arith.constant 0 : index
      %c0_65 = arith.constant 0 : index
      %101 = vector.load %arg6[%c1_63, %c0_64, %c0_65] : memref<4x8x8xf32, #tpu.memory_space<vmem>>, vector<1x8x8xf32>
      %102 = vector.shape_cast %101 : vector<1x8x8xf32> to vector<8x8xf32>
      %103 = vector.shape_cast %100 : vector<8x8xf32> to vector<1x8x8xf32>
      tpu.vector_store %arg6[%c1_63, %c0_64, %c0_65], %103 {strides = array<i32>} : memref<4x8x8xf32, #tpu.memory_space<vmem>>, vector<1x8x8xf32>,
      %104 = vector.extract_strided_slice %91 {offsets = [0, 40], sizes = [8, 8], strides = [1, 1]} : vector<8x64xf32> to vector<8x8xf32>
      %c1_66 = arith.constant 1 : index
      %c0_67 = arith.constant 0 : index
      %c0_68 = arith.constant 0 : index
      %105 = vector.load %arg7[%c1_66, %c0_67, %c0_68] : memref<4x8x8xf32, #tpu.memory_space<vmem>>, vector<1x8x8xf32>
      %106 = vector.shape_cast %105 : vector<1x8x8xf32> to vector<8x8xf32>
      %107 = vector.shape_cast %104 : vector<8x8xf32> to vector<1x8x8xf32>
      tpu.vector_store %arg7[%c1_66, %c0_67, %c0_68], %107 {strides = array<i32>} : memref<4x8x8xf32, #tpu.memory_space<vmem>>, vector<1x8x8xf32>,
      %108 = vector.extract_strided_slice %91 {offsets = [0, 16], sizes = [8, 8], strides = [1, 1]} : vector<8x64xf32> to vector<8x8xf32>
      %c2_69 = arith.constant 2 : index
      %c0_70 = arith.constant 0 : index
      %c0_71 = arith.constant 0 : index
      %109 = vector.load %arg6[%c2_69, %c0_70, %c0_71] : memref<4x8x8xf32, #tpu.memory_space<vmem>>, vector<1x8x8xf32>
      %110 = vector.shape_cast %109 : vector<1x8x8xf32> to vector<8x8xf32>
      %111 = vector.shape_cast %108 : vector<8x8xf32> to vector<1x8x8xf32>
      tpu.vector_store %arg6[%c2_69, %c0_70, %c0_71], %111 {strides = array<i32>} : memref<4x8x8xf32, #tpu.memory_space<vmem>>, vector<1x8x8xf32>,
      %112 = vector.extract_strided_slice %91 {offsets = [0, 48], sizes = [8, 8], strides = [1, 1]} : vector<8x64xf32> to vector<8x8xf32>
      %c2_72 = arith.constant 2 : index
      %c0_73 = arith.constant 0 : index
      %c0_74 = arith.constant 0 : index
      %113 = vector.load %arg7[%c2_72, %c0_73, %c0_74] : memref<4x8x8xf32, #tpu.memory_space<vmem>>, vector<1x8x8xf32>
      %114 = vector.shape_cast %113 : vector<1x8x8xf32> to vector<8x8xf32>
      %115 = vector.shape_cast %112 : vector<8x8xf32> to vector<1x8x8xf32>
      tpu.vector_store %arg7[%c2_72, %c0_73, %c0_74], %115 {strides = array<i32>} : memref<4x8x8xf32, #tpu.memory_space<vmem>>, vector<1x8x8xf32>,
      %116 = vector.extract_strided_slice %91 {offsets = [0, 24], sizes = [8, 8], strides = [1, 1]} : vector<8x64xf32> to vector<8x8xf32>
      %c3_75 = arith.constant 3 : index
      %c0_76 = arith.constant 0 : index
      %c0_77 = arith.constant 0 : index
      %117 = vector.load %arg6[%c3_75, %c0_76, %c0_77] : memref<4x8x8xf32, #tpu.memory_space<vmem>>, vector<1x8x8xf32>
      %118 = vector.shape_cast %117 : vector<1x8x8xf32> to vector<8x8xf32>
      %119 = vector.shape_cast %116 : vector<8x8xf32> to vector<1x8x8xf32>
      tpu.vector_store %arg6[%c3_75, %c0_76, %c0_77], %119 {strides = array<i32>} : memref<4x8x8xf32, #tpu.memory_space<vmem>>, vector<1x8x8xf32>,
      %120 = vector.extract_strided_slice %91 {offsets = [0, 56], sizes = [8, 8], strides = [1, 1]} : vector<8x64xf32> to vector<8x8xf32>
      %c3_78 = arith.constant 3 : index
      %c0_79 = arith.constant 0 : index
      %c0_80 = arith.constant 0 : index
      %121 = vector.load %arg7[%c3_78, %c0_79, %c0_80] : memref<4x8x8xf32, #tpu.memory_space<vmem>>, vector<1x8x8xf32>
      %122 = vector.shape_cast %121 : vector<1x8x8xf32> to vector<8x8xf32>
      %123 = vector.shape_cast %120 : vector<8x8xf32> to vector<1x8x8xf32>
      tpu.vector_store %arg7[%c3_78, %c0_79, %c0_80], %123 {strides = array<i32>} : memref<4x8x8xf32, #tpu.memory_space<vmem>>, vector<1x8x8xf32>,
    } else {
    }
    %c8_i32 = arith.constant 8 : i32
    %3 = arith.muli %arg1, %c8_i32 : i32
    %4 = tpu.assume_multiple %3, 8 : i32
    %c0_i32_1 = arith.constant 0 : i32
    %c0_i32_2 = arith.constant 0 : i32
    %c0_i32_3 = arith.constant 0 : i32
    %5 = tpu.memref_slice %arg6[%c0_i32_1, %c0_i32_2, %c0_i32_3] : memref<4x8x8xf32, #tpu.memory_space<vmem>> -> memref<1x8x8xf32, #tpu.memory_space<vmem>>
    %6 = tpu.memref_squeeze %5 : memref<1x8x8xf32, #tpu.memory_space<vmem>> -> memref<8x8xf32, #tpu.memory_space<vmem>>
    %7 = arith.index_cast %4 : i32 to index
    %c0 = arith.constant 0 : index
    %8 = vector.load %6[%7, %c0] : memref<8x8xf32, #tpu.memory_space<vmem>>, vector<8x8xf32>
    %c0_4 = arith.constant 0 : index
    %c0_5 = arith.constant 0 : index
    %c0_6 = arith.constant 0 : index
    %9 = vector.load %arg7[%c0_4, %c0_5, %c0_6] : memref<4x8x8xf32, #tpu.memory_space<vmem>>, vector<1x8x8xf32>
    %10 = vector.shape_cast %9 : vector<1x8x8xf32> to vector<8x8xf32>
    %cst = arith.constant dense<0.000000e+00> : vector<8x8xf32>
    %11 = tpu.matmul %8, %10, %cst {dimension_numbers = #tpu.dot_dimension_numbers<[1], [1], [0], [0], [0, 0, 1, 0], [], []>} : vector<8x8xf32>, vector<8x8xf32>, vector<8x8xf32> -> vector<8x8xf32>
    %cst_7 = arith.constant dense<0xFF800000> : vector<8xf32>
    %12 = vector.multi_reduction <maximumf>, %11, %cst_7 [1] : vector<8x8xf32> to vector<8xf32>
    %13 = vector.shape_cast %12 : vector<8xf32> to vector<8x1xf32>
    %14 = vector.broadcast %13 : vector<8x1xf32> to vector<8x8xf32>
    %15 = arith.subf %11, %14 : vector<8x8xf32>
    %16 = math.exp %15 : vector<8x8xf32>
    %cst_8 = arith.constant dense<0.000000e+00> : vector<8xf32>
    %17 = vector.multi_reduction <add>, %16, %cst_8 [1] : vector<8x8xf32> to vector<8xf32>
    %18 = vector.shape_cast %17 : vector<8xf32> to vector<8x1xf32>
    %19 = tpu.reciprocal %18 {approx = true} : vector<8x1xf32> -> vector<8x1xf32>
    %20 = vector.broadcast %19 : vector<8x1xf32> to vector<8x8xf32>
    %21 = arith.mulf %16, %20 : vector<8x8xf32>
    %c0_9 = arith.constant 0 : index
    %c0_10 = arith.constant 0 : index
    %c0_11 = arith.constant 0 : index
    %c0_12 = arith.constant 0 : index
    %22 = vector.load %arg5[%c0_9, %c0_10, %c0_11, %c0_12] : memref<1x4x8x8xf32, #tpu.memory_space<vmem>>, vector<1x1x8x8xf32>
    %23 = vector.shape_cast %22 : vector<1x1x8x8xf32> to vector<8x8xf32>
    %24 = vector.shape_cast %21 : vector<8x8xf32> to vector<1x1x8x8xf32>
    tpu.vector_store %arg5[%c0_9, %c0_10, %c0_11, %c0_12], %24 {strides = array<i32>} : memref<1x4x8x8xf32, #tpu.memory_space<vmem>>, vector<1x1x8x8xf32>,
    %c1_i32 = arith.constant 1 : i32
    %c0_i32_13 = arith.constant 0 : i32
    %c0_i32_14 = arith.constant 0 : i32
    %25 = tpu.memref_slice %arg6[%c1_i32, %c0_i32_13, %c0_i32_14] : memref<4x8x8xf32, #tpu.memory_space<vmem>> -> memref<1x8x8xf32, #tpu.memory_space<vmem>>
    %26 = tpu.memref_squeeze %25 : memref<1x8x8xf32, #tpu.memory_space<vmem>> -> memref<8x8xf32, #tpu.memory_space<vmem>>
    %27 = arith.index_cast %4 : i32 to index
    %c0_15 = arith.constant 0 : index
    %28 = vector.load %26[%27, %c0_15] : memref<8x8xf32, #tpu.memory_space<vmem>>, vector<8x8xf32>
    %c1 = arith.constant 1 : index
    %c0_16 = arith.constant 0 : index
    %c0_17 = arith.constant 0 : index
    %29 = vector.load %arg7[%c1, %c0_16, %c0_17] : memref<4x8x8xf32, #tpu.memory_space<vmem>>, vector<1x8x8xf32>
    %30 = vector.shape_cast %29 : vector<1x8x8xf32> to vector<8x8xf32>
    %cst_18 = arith.constant dense<0.000000e+00> : vector<8x8xf32>
    %31 = tpu.matmul %28, %30, %cst_18 {dimension_numbers = #tpu.dot_dimension_numbers<[1], [1], [0], [0], [0, 0, 1, 0], [], []>} : vector<8x8xf32>, vector<8x8xf32>, vector<8x8xf32> -> vector<8x8xf32>
    %cst_19 = arith.constant dense<0xFF800000> : vector<8xf32>
    %32 = vector.multi_reduction <maximumf>, %31, %cst_19 [1] : vector<8x8xf32> to vector<8xf32>
    %33 = vector.shape_cast %32 : vector<8xf32> to vector<8x1xf32>
    %34 = vector.broadcast %33 : vector<8x1xf32> to vector<8x8xf32>
    %35 = arith.subf %31, %34 : vector<8x8xf32>
    %36 = math.exp %35 : vector<8x8xf32>
    %cst_20 = arith.constant dense<0.000000e+00> : vector<8xf32>
    %37 = vector.multi_reduction <add>, %36, %cst_20 [1] : vector<8x8xf32> to vector<8xf32>
    %38 = vector.shape_cast %37 : vector<8xf32> to vector<8x1xf32>
    %39 = tpu.reciprocal %38 {approx = true} : vector<8x1xf32> -> vector<8x1xf32>
    %40 = vector.broadcast %39 : vector<8x1xf32> to vector<8x8xf32>
    %41 = arith.mulf %36, %40 : vector<8x8xf32>
    %c0_21 = arith.constant 0 : index
    %c1_22 = arith.constant 1 : index
    %c0_23 = arith.constant 0 : index
    %c0_24 = arith.constant 0 : index
    %42 = vector.load %arg5[%c0_21, %c1_22, %c0_23, %c0_24] : memref<1x4x8x8xf32, #tpu.memory_space<vmem>>, vector<1x1x8x8xf32>
    %43 = vector.shape_cast %42 : vector<1x1x8x8xf32> to vector<8x8xf32>
    %44 = vector.shape_cast %41 : vector<8x8xf32> to vector<1x1x8x8xf32>
    tpu.vector_store %arg5[%c0_21, %c1_22, %c0_23, %c0_24], %44 {strides = array<i32>} : memref<1x4x8x8xf32, #tpu.memory_space<vmem>>, vector<1x1x8x8xf32>,
    %c2_i32 = arith.constant 2 : i32
    %c0_i32_25 = arith.constant 0 : i32
    %c0_i32_26 = arith.constant 0 : i32
    %45 = tpu.memref_slice %arg6[%c2_i32, %c0_i32_25, %c0_i32_26] : memref<4x8x8xf32, #tpu.memory_space<vmem>> -> memref<1x8x8xf32, #tpu.memory_space<vmem>>
    %46 = tpu.memref_squeeze %45 : memref<1x8x8xf32, #tpu.memory_space<vmem>> -> memref<8x8xf32, #tpu.memory_space<vmem>>
    %47 = arith.index_cast %4 : i32 to index
    %c0_27 = arith.constant 0 : index
    %48 = vector.load %46[%47, %c0_27] : memref<8x8xf32, #tpu.memory_space<vmem>>, vector<8x8xf32>
    %c2 = arith.constant 2 : index
    %c0_28 = arith.constant 0 : index
    %c0_29 = arith.constant 0 : index
    %49 = vector.load %arg7[%c2, %c0_28, %c0_29] : memref<4x8x8xf32, #tpu.memory_space<vmem>>, vector<1x8x8xf32>
    %50 = vector.shape_cast %49 : vector<1x8x8xf32> to vector<8x8xf32>
    %cst_30 = arith.constant dense<0.000000e+00> : vector<8x8xf32>
    %51 = tpu.matmul %48, %50, %cst_30 {dimension_numbers = #tpu.dot_dimension_numbers<[1], [1], [0], [0], [0, 0, 1, 0], [], []>} : vector<8x8xf32>, vector<8x8xf32>, vector<8x8xf32> -> vector<8x8xf32>
    %cst_31 = arith.constant dense<0xFF800000> : vector<8xf32>
    %52 = vector.multi_reduction <maximumf>, %51, %cst_31 [1] : vector<8x8xf32> to vector<8xf32>
    %53 = vector.shape_cast %52 : vector<8xf32> to vector<8x1xf32>
    %54 = vector.broadcast %53 : vector<8x1xf32> to vector<8x8xf32>
    %55 = arith.subf %51, %54 : vector<8x8xf32>
    %56 = math.exp %55 : vector<8x8xf32>
    %cst_32 = arith.constant dense<0.000000e+00> : vector<8xf32>
    %57 = vector.multi_reduction <add>, %56, %cst_32 [1] : vector<8x8xf32> to vector<8xf32>
    %58 = vector.shape_cast %57 : vector<8xf32> to vector<8x1xf32>
    %59 = tpu.reciprocal %58 {approx = true} : vector<8x1xf32> -> vector<8x1xf32>
    %60 = vector.broadcast %59 : vector<8x1xf32> to vector<8x8xf32>
    %61 = arith.mulf %56, %60 : vector<8x8xf32>
    %c0_33 = arith.constant 0 : index
    %c2_34 = arith.constant 2 : index
    %c0_35 = arith.constant 0 : index
    %c0_36 = arith.constant 0 : index
    %62 = vector.load %arg5[%c0_33, %c2_34, %c0_35, %c0_36] : memref<1x4x8x8xf32, #tpu.memory_space<vmem>>, vector<1x1x8x8xf32>
    %63 = vector.shape_cast %62 : vector<1x1x8x8xf32> to vector<8x8xf32>
    %64 = vector.shape_cast %61 : vector<8x8xf32> to vector<1x1x8x8xf32>
    tpu.vector_store %arg5[%c0_33, %c2_34, %c0_35, %c0_36], %64 {strides = array<i32>} : memref<1x4x8x8xf32, #tpu.memory_space<vmem>>, vector<1x1x8x8xf32>,
    %c3_i32 = arith.constant 3 : i32
    %c0_i32_37 = arith.constant 0 : i32
    %c0_i32_38 = arith.constant 0 : i32
    %65 = tpu.memref_slice %arg6[%c3_i32, %c0_i32_37, %c0_i32_38] : memref<4x8x8xf32, #tpu.memory_space<vmem>> -> memref<1x8x8xf32, #tpu.memory_space<vmem>>
    %66 = tpu.memref_squeeze %65 : memref<1x8x8xf32, #tpu.memory_space<vmem>> -> memref<8x8xf32, #tpu.memory_space<vmem>>
    %67 = arith.index_cast %4 : i32 to index
    %c0_39 = arith.constant 0 : index
    %68 = vector.load %66[%67, %c0_39] : memref<8x8xf32, #tpu.memory_space<vmem>>, vector<8x8xf32>
    %c3 = arith.constant 3 : index
    %c0_40 = arith.constant 0 : index
    %c0_41 = arith.constant 0 : index
    %69 = vector.load %arg7[%c3, %c0_40, %c0_41] : memref<4x8x8xf32, #tpu.memory_space<vmem>>, vector<1x8x8xf32>
    %70 = vector.shape_cast %69 : vector<1x8x8xf32> to vector<8x8xf32>
    %cst_42 = arith.constant dense<0.000000e+00> : vector<8x8xf32>
    %71 = tpu.matmul %68, %70, %cst_42 {dimension_numbers = #tpu.dot_dimension_numbers<[1], [1], [0], [0], [0, 0, 1, 0], [], []>} : vector<8x8xf32>, vector<8x8xf32>, vector<8x8xf32> -> vector<8x8xf32>
    %cst_43 = arith.constant dense<0xFF800000> : vector<8xf32>
    %72 = vector.multi_reduction <maximumf>, %71, %cst_43 [1] : vector<8x8xf32> to vector<8xf32>
    %73 = vector.shape_cast %72 : vector<8xf32> to vector<8x1xf32>
    %74 = vector.broadcast %73 : vector<8x1xf32> to vector<8x8xf32>
    %75 = arith.subf %71, %74 : vector<8x8xf32>
    %76 = math.exp %75 : vector<8x8xf32>
    %cst_44 = arith.constant dense<0.000000e+00> : vector<8xf32>
    %77 = vector.multi_reduction <add>, %76, %cst_44 [1] : vector<8x8xf32> to vector<8xf32>
    %78 = vector.shape_cast %77 : vector<8xf32> to vector<8x1xf32>
    %79 = tpu.reciprocal %78 {approx = true} : vector<8x1xf32> -> vector<8x1xf32>
    %80 = vector.broadcast %79 : vector<8x1xf32> to vector<8x8xf32>
    %81 = arith.mulf %76, %80 : vector<8x8xf32>
    %c0_45 = arith.constant 0 : index
    %c3_46 = arith.constant 3 : index
    %c0_47 = arith.constant 0 : index
    %c0_48 = arith.constant 0 : index
    %82 = vector.load %arg5[%c0_45, %c3_46, %c0_47, %c0_48] : memref<1x4x8x8xf32, #tpu.memory_space<vmem>>, vector<1x1x8x8xf32>
    %83 = vector.shape_cast %82 : vector<1x1x8x8xf32> to vector<8x8xf32>
    %84 = vector.shape_cast %81 : vector<8x8xf32> to vector<1x1x8x8xf32>
    tpu.vector_store %arg5[%c0_45, %c3_46, %c0_47, %c0_48], %84 {strides = array<i32>} : memref<1x4x8x8xf32, #tpu.memory_space<vmem>>, vector<1x1x8x8xf32>,
    return
  }
  func.func @transform_0(%arg0: i32, %arg1: i32) -> (i32, i32, i32) {
    %c0_i32 = arith.constant 0 : i32
    %c0_i32_0 = arith.constant 0 : i32
    %c0_i32_1 = arith.constant 0 : i32
    return %arg0, %c0_i32, %c0_i32_0 : i32, i32, i32
  }
  func.func @transform_1(%arg0: i32, %arg1: i32) -> (i32, i32) {
    %c0_i32 = arith.constant 0 : i32
    %c0_i32_0 = arith.constant 0 : i32
    %c0_i32_1 = arith.constant 0 : i32
    return %c0_i32, %c0_i32_0 : i32, i32
  }
  func.func @transform_2(%arg0: i32, %arg1: i32) -> (i32, i32) {
    %c0_i32 = arith.constant 0 : i32
    %c0_i32_0 = arith.constant 0 : i32
    %c0_i32_1 = arith.constant 0 : i32
    return %c0_i32, %c0_i32_0 : i32, i32
  }
  func.func @transform_3(%arg0: i32, %arg1: i32) -> (i32, i32, i32, i32) {
    %c0_i32 = arith.constant 0 : i32
    %c0_i32_0 = arith.constant 0 : i32
    %c0_i32_1 = arith.constant 0 : i32
    return %arg0, %c0_i32, %arg1, %c0_i32_0 : i32, i32, i32, i32
  }
}

</mosaic_0001>

<bundles_post_ra>
// kernel: tpu_custom_call.1
= control target key start
LH: loop header
LB: loop body
LE: loop exit
PB: predicated region body
PF: predicated region fallthrough
CT: control target
= control target key end

     0   :  { %8 = vsyncpa [#allocation5], 0  ;;  %s1467_s0 = inlined_call_operand.hbm [shape: f32[2,8,32], index: 0, kind: input, shape index: {}]   ;;  %s1468_s1 = inlined_call_operand.hbm [shape: f32[32,64], index: 1, kind: input, shape index: {}]   ;;  %s1469_s2 = inlined_call_operand.vmem [shape: f32[1,64], index: 2, kind: input, shape index: {}]   ;;  %s1470_s3 = inlined_call_operand.hbm [shape: f32[2,4,8,8], index: 3, kind: output, shape index: {}]  }
   0x1   :  { %10 = vsyncpa [#allocation5 + $0x1], 0 }
   0x2   :  { %11 = vsyncpa [#allocation8], 0 }
   0x3   :  { %12 = vsyncpa [#allocation6], 0 }
   0x4   :  { %14 = vsyncpa [#allocation6 + $0x1], 0  ;;  %s1205_s12 = smov 0   ;;  %s1207_s13 = smov 0  }
   0x5   :  { %s1209_s14 = smov 0   ;;  %s1211_s15 = smov 0  }
   0x6   :  { %s1213_s16 = smov 0   ;;  %s1215_s17 = smov 0  }
   0x7 LB: > { %s836_s18 = sadd.s32 4294967295, %s1166_s17   ;;  %s837_s19 = sadd.s32 4294967294, %s1166_s17   ;;  %s1166_s17 = sphi %s1215_s17, %s20_s17   ;;  %s1162_s16 = sphi %s1213_s16, %s1494_s16   ;;  %s1158_s15 = sphi %s1211_s15, %s1493_s15   ;;  %s1154_s14 = sphi %s1209_s14, %s1492_s14   ;;  %s1150_s13 = sphi %s1207_s13, %s1491_s13   ;;  %s1146_s12 = sphi %s1205_s12, %s1490_s12  }
   0x8   : > { %p52_p0 = scmp.ne.s32.totalorder %s1150_s13, %s1146_s12  ;;  %p1239_p1 = scmp.eq.s32.totalorder %s836_s18, 0 }
   0x9   : > { %p1243_p2 = scmp.eq.s32.totalorder %s836_s18, 1  ;;  %p126_p3 = scmp.eq.s32.totalorder %s837_s19, 1 }
   0xa   : > { %s1475_s20 = scalar_select %p1239_p1, 1, 0 }
   0xb   : > { %s1476_s21 = scalar_select %p1243_p2, 1, 0 }
   0xc   : > { %p1249_p4 = por %p1239_p1, %p52_p0  ;;  %p838_p5 = scmp.ge.s32.totalorder %s1166_s17, 1 }
   0xd   : > { %p1254_p6 = por %p126_p3, %p52_p0  ;;  %p133_p7 = scmp.lt.s32.totalorder %s1166_s17, 3 }
   0xe   : > { %s1477_s22 = scalar_select %p1249_p4, 1, 0 }
   0xf   : > { %s1478_s23 = scalar_select %p1254_p6, 1, 0 }
  0x10   : > { %p1259_p8 = pnand %p838_p5, %p133_p7  ;;  %s1168_s25 = smov [#allocation7]  }
  0x11   : > { %s145_s26 = sshll.u32 %s1168_s25, 4  ;;  %s32_s28 = sadd.s32 1, %s1162_s16  ;;  %s146_s26 = int_to_ptr.vmem [resolvable:$true] %s145_s26 }
  0x12   : > { %s1479_s24 = scalar_select %p1259_p8, 1, 0 }
  0x13   : > { %p927_p9 = pneg %p1259_p8  ;;  %s1022_s4 = scalar_lea.hbm %s1468_s1, 512 }
  0x14   : > { %p1023_p12 = scmp.ne.s32.totalorder %s1468_s1, %s1022_s4  ;;  %p1029_p5 = scmp.lt.u32.totalorder %s1022_s4, %s1468_s1 }
  0x15   : > { %p1268_p11 = pnand %p927_p9, %p1239_p1 }
  0x17   : > { %p1024_p13 = pneg %p1268_p11 }
  0x19   : > { %p1025_p0 = pnand %p1024_p13, %p1023_p12 }
  0x1b   : > { %p1026_p3 = pneg %p1025_p0 }
  0x1d   : > { %p1031_p7 = pnand %p1029_p5, %p1026_p3 }
  0x1f   : > { %1034 = shalt.err (!%p1031_p7)
}
  0x20   : > { %s1035_s9 = scalar_lea.vmem %s146_s26, 512  ;;  %p1043_p1 = scmp.lt.s32.totalorder %s146_s26, %s146_s26 }
  0x21   : > { %p1036_p9 = scmp.ne.s32.totalorder %s146_s26, %s1035_s9  ;;  %p1044_p4 = scmp.lt.s32.totalorder %s1035_s9, %s1035_s9 }
  0x23   : > { %p1038_p10 = pnand %p1036_p9, %p1024_p13  ;;  %p1045_p8 = por %p1044_p4, %p1043_p1 }
  0x25   : > { %p1039_p6 = pneg %p1038_p10 }
  0x27   : > { %p1046_p2 = pnand %p1045_p8, %p1039_p6 }
  0x29   : > { %1049 = shalt.err (!%p1046_p2)
}
  0x2a   : > { %s1169_s10 = smov 128   ;;  %s1170_s11 = smov 8  }
  0x2b   : > { %930 = dma.hbm_to_vmem [thread:$0]  (!%p1268_p11), %s1468_s1, 512, %s146_s26, [#allocation8], %s1169_s10, %s1169_s10, %s1170_s11  }
  0x2c   : > { %p34_p1 = scmp.ge.s32.totalorder %s32_s28, 2  ;;  %s39_s25 = sadd.s32 1, %s1154_s14 }
  0x2d   : > { %p46_p2 = scmp.ne.s32.totalorder %s1154_s14, %s1150_s13  ;;  %p47_p4 = scmp.eq.s32.totalorder %s1166_s17, 0 }
  0x2e   : > { %s1496_s28 = smov (%p34_p1, %s32_s28), 0  ;;  %p1482_p8 = scmp.ne.s32.totalorder %s1476_s21, 0 }
  0x2f   : > { %p1295_p6 = por %p47_p4, %p46_p2  ;;  %s36_s27 = ssub.s32 %s1162_s16, %s1496_s28 }
  0x30   : > { %p1301_p10 = por %p1482_p8, %p46_p2  ;;  %p940_p12 = scmp.lt.s32.totalorder %s1166_s17, 2 }
  0x31   : > { %p37_p11 = scmp.eq.s32.totalorder %s36_s27, 0  ;;  %s162_s26 = sand.u32 1, %s1154_s14  }
  0x32   : > { %s841_s4 = sshll.u32 %s162_s26, 3  ;;  %s842_s6 = sshll.u32 %s1162_s16, 7 }
  0x33   : > { %s1310_s5 = scalar_select %p37_p11, %s1154_s14, %s39_s25  }
  0x34   : > { %s1316_s9 = scalar_lea.hbm %s1467_s0, %s842_s6  ;;  %s166_s21 = scalar_lea.vmem [#allocation4], %s841_s4 }
  0x35   : > { %s173_s10 = sshll.u32 %s166_s21, 4  ;;  %p1322_p13 = pnand %p940_p12, %p1295_p6  ;;  %s1318_s10 = int_to_ptr.vmem [resolvable:$true] %s173_s10 }
  0x36   : > { %s163_s18 = scalar_lea.sflag [#allocation5], %s162_s26  ;;  %s1050_s19 = scalar_lea.hbm %s1316_s9, 128 }
  0x37   : > { %p1051_p0 = scmp.ne.s32.totalorder %s1316_s9, %s1050_s19  ;;  %p1052_p3 = pneg %p1322_p13 }
  0x38   : > { %s1055_s4 = scalar_lea.hbm %s1467_s0, 256  ;;  %p1056_p9 = scmp.lt.u32.totalorder %s1316_s9, %s1467_s0 }
  0x39   : > { %p1053_p5 = pnand %p1052_p3, %p1051_p0  ;;  %p1057_p1 = scmp.lt.u32.totalorder %s1055_s4, %s1050_s19 }
  0x3a   : > { %p1059_p4 = scmp.lt.u32.totalorder %s1050_s19, %s1316_s9 }
  0x3b   : > { %p1054_p7 = pneg %p1053_p5  ;;  %p1058_p2 = por %p1057_p1, %p1056_p9 }
  0x3d   : > { %p1060_p6 = por %p1059_p4, %p1058_p2 }
  0x3f   : > { %p1061_p8 = pnand %p1060_p6, %p1054_p7 }
  0x41   : > { %1064 = shalt.err (!%p1061_p8)
}
  0x42   : > { %s1065_s26 = scalar_lea.vmem %s1318_s10, 128  ;;  %s1171_s7 = smov [#allocation4]  }
  0x43   : > { %p1066_p12 = scmp.ne.s32.totalorder %s1318_s10, %s1065_s26  ;;  %s1070_s8 = sshll.u32 %s1171_s7, 4  ;;  %s1071_s8 = int_to_ptr.vmem [resolvable:$false] %s1070_s8 }
  0x44   : > { %s1072_s21 = scalar_lea.vmem %s1071_s8, 256  ;;  %p1073_p5 = scmp.lt.s32.totalorder %s1318_s10, %s1071_s8 }
  0x45   : > { %p1068_p11 = pnand %p1066_p12, %p1052_p3  ;;  %p1074_p9 = scmp.lt.s32.totalorder %s1072_s21, %s1065_s26 }
  0x47   : > { %p1069_p0 = pneg %p1068_p11  ;;  %p1075_p1 = por %p1074_p9, %p1073_p5 }
  0x49   : > { %p1076_p2 = pnand %p1075_p1, %p1069_p0 }
  0x4b   : > { %1079 = shalt.err (!%p1076_p2)
}
  0x4c   : > { %934 = dma.hbm_to_vmem [thread:$0]  (!%p1322_p13), %s1316_s9, 128, %s1318_s10, %s163_s18  }
  0x4d   : > { %p1485_p7 = scmp.ne.s32.totalorder %s1479_s24, 0 }
  0x4e   : > { %s1354_s19 = sand.u32 (!%p1485_p7), 1, %s1150_s13   ;;  %p1486_p3 = scmp.ne.s32.totalorder (!%p1485_p7), %s1477_s22, 0 }
  0x4f   : > { %182 = sbr.rel (%p1485_p7) target bundleno = 991 (0x3df), region = 32  ;;  %s844_s25 = sshll.u32 (!%p1485_p7), %s1354_s19, 3 }
  0x50   : > { %s185_s27 = scalar_lea.sflag (!%p1485_p7), [#allocation5], %s1354_s19  ;;  %s188_s4 = scalar_lea.vmem (!%p1485_p7), [#allocation4], %s844_s25 }
  0x56   : > { %1133 = dma.done.wait (%p1486_p3), %s185_s27, 128  }
  0x57   : > { %1135 = vsyncadd (%p1486_p3), %s185_s27, 4294967168  ;;  %p1487_p4 = scmp.ne.s32.totalorder %s1475_s20, 0 }
  0x59   : > { %1137 = dma.done.wait (%p1487_p4), [#allocation8], 512  }
  0x5a   : > { %1139 = vsyncadd (%p1487_p4), [#allocation8], 4294966784  ;;  %v1172_v0 = vmov 0.0|0.0   ;;  %vm1173_vm0 = vmmov 0   ;;  %v1174_v1 = vmov 0.0   ;;  %v220_v2 = vld [vmem:[#allocation7] sm:$0xff] }
  0x5b   : > { %913 = vmatprep.subr.bf16.mxu0 %v1172_v0  ;;  %890 = vmatprep.mubr.msk.f32.mxu0 %vm1173_vm0, %v1174_v1  ;;  %v221_v3 = vld [vmem:[#allocation7 + $0x8] sm:$0xff]  ;;  %v222_v4 = vld [vmem:[#allocation7 + $0x10] sm:$0xff]  ;;  %v223_v6 = vld [vmem:[#allocation7 + $0x18] sm:$0xff]  ;;  %vm231_vm1 = vcmask 261120   ;;  %vm305_vm2 = vcmask 64512   ;;  %s1175_s24 = smov 120  }
  0x5c   : > { %893 = vmatprep.subr.mxu1 %v1174_v1  ;;  %895 = vmatprep.mubr.msk.f32.mxu1 %vm1173_vm0, %v1174_v1  ;;  %v914_v5 = vpack.c.bf16 %v221_v3, %v220_v2  ;;  %v917_v7 = vpack.c.bf16 %v223_v6, %v222_v4  ;;  %v219_v8 = vld [vmem:[%s188_s4] sm:$0xff]  ;;  %s1176_s9 = smov 96   ;;  %s1177_s10 = smov 80  }
  0x5d   : > { %v847_v9 = vld [vmem:[%s1469_s2] ss:$0 sm:$0xff]  ;;  %s1178_s11 = smov 88   ;;  %s1179_s18 = smov 112  }
  0x5e   : > { %915 = vmatpush3.bf16.msra.mxu0 %v914_v5  ;;  %s1180_s29 = smov 72   ;;  %s1181_s6 = smov 104  }
  0x5f   : > { %916 = vmatprep.subr.bf16.mxu0 %v1172_v0  ;;  %s846_s26 = sshll.u32 %s1354_s19, 5  ;;  %s868_s8 = sshll.u32 %s1158_s15, 9 }
  0x60   : > { %s214_s7 = scalar_lea.vmem [#allocation9], %s846_s26  ;;  %s1414_s4 = scalar_lea.hbm %s1470_s3, %s868_s8 }
  0x61   : > { %s732_s21 = sshll.u32 %s214_s7, 4  ;;  %s718_s15 = scalar_lea.sflag [#allocation6], %s1354_s19  ;;  %s1416_s21 = int_to_ptr.vmem [resolvable:$true] %s732_s21 }
  0x62   : > { %918 = vmatpush3.bf16.msra.mxu0 %v917_v7  ;;  %s1080_s20 = scalar_lea.vmem %s1416_s21, 512  ;;  %s1182_s22 = smov [#allocation9]  }
  0x63   : > { %903 = vmatprep.subr.mxu0 %v1174_v1  ;;  %p1081_p13 = scmp.ne.s32.totalorder %s1416_s21, %s1080_s20 }
  0x65   : > { %891 = vmatmul.mubr.msk.f32.vlgmr.msra.gmra.mrb[0].mxu0 %vm231_vm1, %v219_v8  ;;  %p1082_p6 = pnand %p1081_p13, %p1301_p10 }
  0x66   : > { %905 = vmatprep.mubr.msk.f32.mxu0 %vm1173_vm0, %v1174_v1 }
  0x67   : > { %p1083_p8 = pneg %p1082_p6 }
 0x138   : > { %v301_v10 = vpop.f32.mrb[0].mxu0 }
 0x139   : > { %v302_v11 = vadd.f32 %v847_v9, %v301_v10  ;;  %v892_v12 = vpop.f32.mrb[1].mxu0 }
 0x13b   : > { %306 = vst.msk [vmem:[#allocation2] sm:$0xff] %vm305_vm2, %v302_v11  ;;  %312 = vrot.lane.b32.xlu1 %v302_v11, %s1175_s24  ;;  %308 = vrot.lane.b32.xlu0 %v302_v11, %s1176_s9  ;;  %s1084_s24 = sshll.u32 %s1182_s22, 4  ;;  %s1085_s24 = int_to_ptr.vmem [resolvable:$false] %s1084_s24 }
 0x13c   : > { %s1086_s9 = scalar_lea.vmem %s1085_s24, 1024  ;;  %p1087_p12 = scmp.lt.s32.totalorder %s1416_s21, %s1085_s24 }
 0x13d   : > { %p1088_p11 = scmp.lt.s32.totalorder %s1086_s9, %s1080_s20 }
 0x13f   : > { %327 = vrot.lane.b32.xlu1 %v302_v11, %s1177_s10  ;;  %317 = vrot.lane.b32.xlu0 %v302_v11, %s1178_s11  ;;  %p1089_p0 = por %p1088_p11, %p1087_p12 }
 0x141   : > { %p1090_p5 = pnand %p1089_p0, %p1083_p8 }
 0x142   : > { %v344_v20 = vld [vmem:[#allocation2] sm:$0xff] }
 0x143   : > { %322 = vrot.lane.b32.xlu1 %v302_v11, %s1179_s18  ;;  %337 = vrot.lane.b32.xlu0 %v302_v11, %s1180_s29 }
 0x147   : > { %332 = vrot.lane.b32.xlu0 %v302_v11, %s1181_s6 }
 0x1ad   : > { %v313_v13 = vpop.permute.xlu1 %312  ;;  %v309_v14 = vpop.permute.xlu0 %308 }
 0x1ae   : > { %316 = vst.msk [vmem:[#allocation2 + $0x8] sm:$0xff] %vm305_vm2, %v313_v13  ;;  %311 = vst.msk [vmem:[#allocation3] sm:$0xff] %vm305_vm2, %v309_v14 }
 0x1b1   : > { %v328_v15 = vpop.permute.xlu1 %327  ;;  %v318_v16 = vpop.permute.xlu0 %317 }
 0x1b2   : > { %331 = vst.msk [vmem:[#allocation3 + $0x10] sm:$0xff] %vm305_vm2, %v328_v15  ;;  %321 = vst.msk [vmem:[#allocation3 + $0x8] sm:$0xff] %vm305_vm2, %v318_v16 }
 0x1b5   : > { %v323_v17 = vpop.permute.xlu1 %322  ;;  %v338_v18 = vpop.permute.xlu0 %337  ;;  %v345_v19 = vld [vmem:[#allocation3] sm:$0xff]  ;;  %v851_v24 = vld [vmem:[#allocation2 + $0x8] sm:$0xff] }
 0x1b6   : > { %326 = vst.msk [vmem:[#allocation2 + $0x10] sm:$0xff] %vm305_vm2, %v323_v17  ;;  %341 = vst.msk [vmem:[#allocation3 + $0x18] sm:$0xff] %vm305_vm2, %v338_v18  ;;  %894 = vmatpush3.xpose.msk.msra.mxu1 %vm305_vm2, %v345_v19 }
 0x1b7   : > { %898 = vmatprep.subr.mxu1 %v1174_v1 }
 0x1b9   : > { %v333_v21 = vpop.permute.xlu0 %332  ;;  %896 = vmatmul.mubr.msk.f32.vlgmr.msra.gmra.mrb[0].mxu1 %vm305_vm2, %v344_v20  ;;  %v439_v22 = vld [vmem:[#allocation3 + $0x8] sm:$0xff]  ;;  %v533_v23 = vld [vmem:[#allocation3 + $0x10] sm:$0xff] }
 0x1ba   : > { %336 = vst.msk [vmem:[#allocation2 + $0x18] sm:$0xff] %vm305_vm2, %v333_v21  ;;  %899 = vmatpush3.xpose.msk.msra.mxu1 %vm305_vm2, %v439_v22  ;;  %904 = vmatpush3.xpose.msk.msra.mxu0 %vm305_vm2, %v533_v23 }
 0x1bb   : > { %900 = vmatprep.mubr.msk.f32.mxu1 %vm1173_vm0, %v1174_v1  ;;  %908 = vmatprep.subr.mxu1 %v1174_v1 }
 0x1bd   : > { %901 = vmatmul.mubr.msk.f32.vlgmr.msra.gmra.mrb[2].mxu1 %vm305_vm2, %v851_v24  ;;  %v855_v25 = vld [vmem:[#allocation2 + $0x10] sm:$0xff]  ;;  %v627_v26 = vld [vmem:[#allocation3 + $0x18] sm:$0xff] }
 0x1be   : > { %906 = vmatmul.mubr.msk.f32.vlgmr.msra.gmra.mrb[2].mxu0 %vm305_vm2, %v855_v25  ;;  %909 = vmatpush3.xpose.msk.msra.mxu1 %vm305_vm2, %v627_v26 }
 0x1bf   : > { %910 = vmatprep.mubr.msk.f32.mxu1 %vm1173_vm0, %v1174_v1 }
 0x1c1   : > { %v859_v27 = vld [vmem:[#allocation2 + $0x18] sm:$0xff] }
 0x1c2   : > { %911 = vmatmul.mubr.msk.f32.vlgmr.msra.gmra.mrb[4].mxu1 %vm305_vm2, %v859_v27 }
 0x28c   : > { %v419_v28 = vpop.f32.mrb[0].mxu1 }
 0x28d   : > { %v897_v29 = vpop.f32.mrb[1].mxu1  ;;  %v423_v30 = vsel %vm305_vm2, %v419_v28, -inf }
 0x28e   : > { %424 = vmax.xlane.f32.xlu1 %v423_v30 }
 0x290   : > { %v512_v31 = vpop.f32.mrb[2].mxu1 }
 0x291   : > { %v902_v32 = vpop.f32.mrb[3].mxu1  ;;  %v606_v33 = vpop.f32.mrb[2].mxu0  ;;  %v516_v34 = vsel %vm305_vm2, %v512_v31, -inf }
 0x292   : > { %517 = vmax.xlane.f32.xlu0 %v516_v34  ;;  %v907_v35 = vpop.f32.mrb[3].mxu0  ;;  %v610_v37 = vsel %vm305_vm2, %v606_v33, -inf }
 0x295   : > { %v700_v36 = vpop.f32.mrb[4].mxu1 }
 0x296   : > { %v912_v38 = vpop.f32.mrb[5].mxu1  ;;  %611 = vmax.xlane.f32.xlu0 %v610_v37  ;;  %v704_v39 = vsel %vm305_vm2, %v700_v36, -inf }
 0x297   : > { %705 = vmax.xlane.f32.xlu1 %v704_v39 }
 0x31b   : > { %v425_v40 = vpop.xlane.xlu1 %424 }
 0x31c   : > { %v426_v41 = vsub.f32 %v419_v28, %v425_v40 }
 0x31e   : > { %v427_v42 = vmul.f32 1.442695, %v426_v41 }
 0x31f   : > { %v518_v43 = vpop.xlane.xlu0 %517 }
 0x320   : > { %1006 = vpow2.f32 %v427_v42  ;;  %v519_v44 = vsub.f32 %v512_v31, %v518_v43 }
 0x322   : > { %v520_v45 = vmul.f32 1.442695, %v519_v44 }
 0x323   : > { %v612_v46 = vpop.xlane.xlu0 %611 }
 0x324   : > { %1008 = vpow2.f32 %v520_v45  ;;  %v613_v47 = vsub.f32 %v606_v33, %v612_v46  ;;  %v706_v48 = vpop.xlane.xlu1 %705 }
 0x325   : > { %v707_v49 = vsub.f32 %v700_v36, %v706_v48 }
 0x326   : > { %v614_v50 = vmul.f32 1.442695, %v613_v47 }
 0x327   : > { %v708_v51 = vmul.f32 1.442695, %v707_v49 }
 0x328   : > { %1010 = vpow2.f32 %v614_v50 }
 0x329   : > { %1012 = vpow2.f32 %v708_v51 }
 0x32a   : > { %v1007_v52 = vpop.eup %1006 }
 0x32b   : > { %v429_v53 = vsel %vm305_vm2, %v1007_v52, 0.0 }
 0x32c   : > { %430 = vadd.xlane.f32.xlu0 %v429_v53 }
 0x32e   : > { %v1009_v54 = vpop.eup %1008 }
 0x32f   : > { %v522_v55 = vsel %vm305_vm2, %v1009_v54, 0.0 }
 0x330   : > { %523 = vadd.xlane.f32.xlu1 %v522_v55 }
 0x332   : > { %v1011_v56 = vpop.eup %1010 }
 0x333   : > { %v1013_v57 = vpop.eup %1012  ;;  %v616_v58 = vsel %vm305_vm2, %v1011_v56, 0.0 }
 0x334   : > { %617 = vadd.xlane.f32.xlu0 %v616_v58  ;;  %v710_v59 = vsel %vm305_vm2, %v1013_v57, 0.0 }
 0x335   : > { %711 = vadd.xlane.f32.xlu1 %v710_v59 }
 0x3b9   : > { %v431_v60 = vpop.xlane.xlu0 %430 }
 0x3ba   : > { %1014 = vrcp.f32 %v431_v60 }
 0x3bd   : > { %v524_v61 = vpop.xlane.xlu1 %523 }
 0x3be   : > { %1016 = vrcp.f32 %v524_v61 }
 0x3c1   : > { %v618_v62 = vpop.xlane.xlu0 %617 }
 0x3c2   : > { %1018 = vrcp.f32 %v618_v62  ;;  %v712_v63 = vpop.xlane.xlu1 %711 }
 0x3c3   : > { %1020 = vrcp.f32 %v712_v63 }
 0x3c4   : > { %v1015_v0 = vpop.eup %1014 }
 0x3c5   : > { %v433_v1 = vmul.f32 %v1015_v0, %v1007_v52 }
 0x3c7   : > { %434 = vst.msk [vmem:[%s214_s7] sm:$0xff] %vm305_vm2, %v433_v1 }
 0x3c8   : > { %v1017_v2 = vpop.eup %1016 }
 0x3c9   : > { %v526_v3 = vmul.f32 %v1017_v2, %v1009_v54 }
 0x3cb   : > { %854 = vst.msk [vmem:[%s214_s7 + $0x8] sm:$0xff] %vm305_vm2, %v526_v3 }
 0x3cc   : > { %v1019_v4 = vpop.eup %1018 }
 0x3cd   : > { %v1021_v5 = vpop.eup %1020  ;;  %v620_v6 = vmul.f32 %v1019_v4, %v1011_v56 }
 0x3ce   : > { %v714_v7 = vmul.f32 %v1021_v5, %v1013_v57 }
 0x3cf   : > { %858 = vst.msk [vmem:[%s214_s7 + $0x10] sm:$0xff] %vm305_vm2, %v620_v6 }
 0x3d0   : > { %862 = vst.msk [vmem:[%s214_s7 + $0x18] sm:$0xff] %vm305_vm2, %v714_v7 }
 0x3d1   : > { %1093 = shalt.err (!%p1090_p5)
}
 0x3d2   : > { %s1094_s10 = scalar_lea.hbm %s1414_s4, 512  ;;  %s1098_s29 = scalar_lea.hbm %s1470_s3, 1024 }
 0x3d3   : > { %p1095_p9 = scmp.ne.s32.totalorder %s1414_s4, %s1094_s10  ;;  %p1099_p7 = scmp.lt.u32.totalorder %s1414_s4, %s1470_s3 }
 0x3d4   : > { %p1100_p3 = scmp.lt.u32.totalorder %s1098_s29, %s1094_s10  ;;  %p1102_p13 = scmp.lt.u32.totalorder %s1094_s10, %s1414_s4 }
 0x3d5   : > { %p1096_p1 = pnand %p1095_p9, %p1301_p10 }
 0x3d6   : > { %p1101_p4 = por %p1100_p3, %p1099_p7 }
 0x3d7   : > { %p1097_p2 = pneg %p1096_p1 }
 0x3d8   : > { %p1103_p6 = por %p1102_p13, %p1101_p4 }
 0x3da   : > { %p1104_p8 = pnand %p1103_p6, %p1097_p2 }
 0x3dc   : > { %1107 = shalt.err (!%p1104_p8)
}
 0x3dd   : > { %s1183_s7 = smov 128   ;;  %s1184_s8 = smov 8  }
 0x3de   : > { %925 = dma.vmem_to_hbm [thread:$0]  (%p1301_p10), %s1416_s21, 512, %s1414_s4, %s718_s15, %s1183_s7, %s1183_s7, %s1184_s8  }
 0x3df PF: > { %s747_s25 = sand.u32 1, %s1146_s12   ;;  %p1488_p12 = scmp.ne.s32.totalorder %s1478_s23, 0 }
 0x3e0   : > { %p1489_p11 = scmp.ge.s32.totalorder %s1166_s17, 2  ;;  %s748_s27 = scalar_lea.sflag [#allocation6], %s747_s25 }
 0x3e2   : > { %p936_p0 = pnand %p1489_p11, %p1488_p12 }
 0x3e4   : > { %1141 = dma.done.wait (!%p936_p0), %s748_s27, 512  }
 0x3e5   : > { %1143 = vsyncadd (!%p936_p0), %s748_s27, 4294966784  ;;  %s20_s17 = sadd.s32 1, %s1166_s17   ;;  %s1490_s12 = smov %s1150_s13 }
 0x3e6   : > { %p17_p5 = scmp.ge.s32.totalorder %s20_s17, 4   ;;  %s1491_s13 = smov %s1154_s14 }
 0x3e7   : > { %s1492_s14 = smov %s1310_s5  ;;  %s1493_s15 = smov %s1162_s16 }
 0x3e8   : > { %s1494_s16 = smov %s1496_s28  ;;  %19 = sbr.rel (!%p17_p5) target bundleno = 7 (0x7), region = 104 }
 0x3ef   :  { %753 = vsyncpa [#allocation5], 1 }
 0x3f0   :  { %755 = vsyncpa [#allocation5 + $0x1], 1 }
 0x3f1   :  { %756 = vsyncpa [#allocation8], 1 }
 0x3f2   :  { %757 = vsyncpa [#allocation6], 1 }
 0x3f3   :  { %759 = vsyncpa [#allocation6 + $0x1], 1 }

</bundles_post_ra>
